<compile_context>
chip_gen: v6e
topology: v6e:2x2x1
jax: 0.10.0
libtpu: 0.0.40
codegen_flags: <defaults>
</compile_context>

<pallas_src>
import functools

import jax
import jax.numpy as jnp
from jax.experimental import pallas as pl
from jax.experimental.pallas import tpu as pltpu

IN_DIM = 784
HID_DIM = 128
OUT_DIM = 10
OUT_PAD = 128      # lane-dense RHS / accumulator for the 2nd matmul (sliced to 10 at the store)
TILE_B_MAX = 1024  # 2 x (1024 x 784 f32) x-blocks + weights ~ 7.3 MiB < every default scoped VMEM


def _round_up(x, m):
    return ((x + m - 1) // m) * m


def _choose_tile(B):
    """Pick (tile_b, grid_b). Tiles are multiples of 8 sublanes, capped at TILE_B_MAX.
    For larger batches use >= 2 tiles so the 'parallel' batch axis can shard across
    the two TensorCores on v7x (negligible cost on single-TC v5e/v6e)."""
    if B <= 256:
        tile_b = _round_up(B, 8)
    else:
        n_tiles = max(2, pl.cdiv(B, TILE_B_MAX))
        tile_b = _round_up(pl.cdiv(B, n_tiles), 8)
    return tile_b, pl.cdiv(B, tile_b)


def _mlp_kernel(x_ref, w1_ref, b1_ref, w2_ref, b2_ref, o_ref):
    # x_ref:  (tile_b, 784)  f32   streamed per batch tile
    # w1_ref: (784, 128)     f32   grid-invariant -> fetched once, VMEM-resident
    # b1_ref: (1, 128)       f32
    # w2_ref: (128, 128)     bf16  (columns 10..127 are zero)
    # b2_ref: (1, 128)       f32   (zero-padded)
    # o_ref:  (tile_b, 10)   f32
    x = x_ref[...].astype(jnp.bfloat16)        # VPU cast, hidden under the x DMA
    w1 = w1_ref[...].astype(jnp.bfloat16)
    h = jnp.dot(x, w1, preferred_element_type=jnp.float32)
    h = jnp.maximum(h + b1_ref[...], 0.0)      # bias + ReLU in f32
    out = jnp.dot(h.astype(jnp.bfloat16), w2_ref[...],
                  preferred_element_type=jnp.float32) + b2_ref[...]
    o_ref[...] = out[:, :OUT_DIM]              # only the 10 real logits hit HBM


@jax.jit
def ai_model_forward(x, w1, b1, w2, b2):
    """Forward pass: relu(x @ w1 + b1) @ w2 + b2.

    x: (B, 784) f32, w1: (784, 128), b1: (128,) or (1,128),
    w2: (128, 10), b2: (10,) or (1,10). Returns (B, 10) f32.
    """
    B = x.shape[0]
    tile_b, grid_b = _choose_tile(B)

    xf = jnp.asarray(x, jnp.float32)                               # streamed raw (no pad / no cast)
    w1f = jnp.asarray(w1, jnp.float32)                             # cast to bf16 inside the kernel
    b1f = jnp.asarray(b1, jnp.float32).reshape(1, HID_DIM)
    w2p = jnp.pad(jnp.asarray(w2, jnp.float32),
                  ((0, 0), (0, OUT_PAD - OUT_DIM))).astype(jnp.bfloat16)   # tiny one-time op
    b2p = jnp.pad(jnp.asarray(b2, jnp.float32).reshape(1, OUT_DIM),
                  ((0, 0), (0, OUT_PAD - OUT_DIM)))

    flops = 2 * B * (IN_DIM * HID_DIM + HID_DIM * OUT_PAD)
    bytes_accessed = (B * IN_DIM * 4 + IN_DIM * HID_DIM * 4 + HID_DIM * OUT_PAD * 2
                      + HID_DIM * 4 + OUT_PAD * 4 + B * OUT_DIM * 4)

    out = pl.pallas_call(
        _mlp_kernel,
        out_shape=jax.ShapeDtypeStruct((B, OUT_DIM), jnp.float32),
        grid_spec=pltpu.PrefetchScalarGridSpec(
            num_scalar_prefetch=0,
            grid=(grid_b,),
            in_specs=[
                pl.BlockSpec((tile_b, IN_DIM), lambda i: (i, 0)),    # x: streamed per tile
                pl.BlockSpec((IN_DIM, HID_DIM), lambda i: (0, 0)),   # w1: VMEM-resident
                pl.BlockSpec((1, HID_DIM), lambda i: (0, 0)),
                pl.BlockSpec((HID_DIM, OUT_PAD), lambda i: (0, 0)),  # w2: VMEM-resident
                pl.BlockSpec((1, OUT_PAD), lambda i: (0, 0)),
            ],
            out_specs=pl.BlockSpec((tile_b, OUT_DIM), lambda i: (i, 0)),
        ),
        compiler_params=pltpu.CompilerParams(
            # independent batch tiles -> megacore sharding on v7x, pipelined elsewhere
            dimension_semantics=("parallel",),
        ),
        cost_estimate=pl.CostEstimate(
            flops=flops, transcendentals=0, bytes_accessed=bytes_accessed),
    )(xf, w1f, b1f, w2p, b2p)

    return out


def init_params(key):
    # Mimic torch.nn.Linear default init: U[-1/sqrt(fan_in), +1/sqrt(fan_in)].
    k1, k2, k3, k4 = jax.random.split(key, 4)
    bound1 = 1.0 / (IN_DIM ** 0.5)
    bound2 = 1.0 / (HID_DIM ** 0.5)
    w1 = jax.random.uniform(k1, (IN_DIM, HID_DIM), jnp.float32, -bound1, bound1)
    b1 = jax.random.uniform(k2, (1, HID_DIM), jnp.float32, -bound1, bound1)
    w2 = jax.random.uniform(k3, (HID_DIM, OUT_DIM), jnp.float32, -bound2, bound2)
    b2 = jax.random.uniform(k4, (1, OUT_DIM), jnp.float32, -bound2, bound2)
    return w1, b1, w2, b2


if __name__ == "__main__":
    key = jax.random.PRNGKey(0)
    kx, kp = jax.random.split(key)
    B = 8
    x = jax.random.normal(kx, (B, IN_DIM), jnp.float32)
    w1, b1, w2, b2 = init_params(kp)

    out = ai_model_forward(x, w1, b1, w2, b2)
    out = jax.block_until_ready(out)

    # Reference with the same bf16 quantization of the matmul inputs, f32 accumulate.
    xb = x.astype(jnp.bfloat16).astype(jnp.float32)
    w1b = w1.astype(jnp.bfloat16).astype(jnp.float32)
    w2b = w2.astype(jnp.bfloat16).astype(jnp.float32)
    h = jnp.maximum(xb @ w1b + b1, 0.0)
    ref = h.astype(jnp.bfloat16).astype(jnp.float32) @ w2b + b2

    assert out.shape == (B, OUT_DIM)
    assert jnp.allclose(out, ref, atol=5e-3, rtol=5e-3), float(jnp.max(jnp.abs(out - ref)))
    print("KERNEL_OK")
</pallas_src>

<mosaic_0001>
module attributes {stable_mosaic.version = 11 : i64} {
  func.func @_mlp_kernel(%arg0: i32, %arg1: memref<8x784xf32, #tpu.memory_space<vmem>>, %arg2: memref<784x128xf32, #tpu.memory_space<vmem>>, %arg3: memref<1x128xf32, #tpu.memory_space<vmem>>, %arg4: memref<128x128xbf16, #tpu.memory_space<vmem>>, %arg5: memref<1x128xf32, #tpu.memory_space<vmem>>, %arg6: memref<8x10xf32, #tpu.memory_space<vmem>>) attributes {dimension_semantics = [#tpu.dimension_semantics<parallel>], iteration_bounds = array<i64: 1>, scalar_prefetch = 0 : i64, scratch_operands = 0 : i64, tpu.core_type = #tpu.core_type<tc>, window_params = [{transform_indices = @transform_0, window_bounds = array<i64: 8, 784>}, {pipeline_mode = #tpu.pipeline_mode<synchronous>, transform_indices = @transform_1, window_bounds = array<i64: 784, 128>}, {pipeline_mode = #tpu.pipeline_mode<synchronous>, transform_indices = @transform_2, window_bounds = array<i64: 1, 128>}, {pipeline_mode = #tpu.pipeline_mode<synchronous>, transform_indices = @transform_3, window_bounds = array<i64: 128, 128>}, {pipeline_mode = #tpu.pipeline_mode<synchronous>, transform_indices = @transform_4, window_bounds = array<i64: 1, 128>}, {transform_indices = @transform_5, window_bounds = array<i64: 8, 10>}]} {
    %c0 = arith.constant 0 : index
    %c0_0 = arith.constant 0 : index
    %0 = vector.load %arg1[%c0, %c0_0] : memref<8x784xf32, #tpu.memory_space<vmem>>, vector<8x784xf32>
    %1 = arith.truncf %0 : vector<8x784xf32> to vector<8x784xbf16>
    %c0_1 = arith.constant 0 : index
    %c0_2 = arith.constant 0 : index
    %2 = vector.load %arg2[%c0_1, %c0_2] : memref<784x128xf32, #tpu.memory_space<vmem>>, vector<784x128xf32>
    %3 = arith.truncf %2 : vector<784x128xf32> to vector<784x128xbf16>
    %cst = arith.constant dense<0.000000e+00> : vector<8x128xf32>
    %4 = tpu.matmul %1, %3, %cst {dimension_numbers = #tpu.dot_dimension_numbers<[1], [0], [0], [1], [0, 0, 1, 1], [], []>} : vector<8x784xbf16>, vector<784x128xbf16>, vector<8x128xf32> -> vector<8x128xf32>
    %c0_3 = arith.constant 0 : index
    %c0_4 = arith.constant 0 : index
    %5 = vector.load %arg3[%c0_3, %c0_4] : memref<1x128xf32, #tpu.memory_space<vmem>>, vector<1x128xf32>
    %6 = vector.broadcast %5 : vector<1x128xf32> to vector<8x128xf32>
    %7 = arith.addf %4, %6 : vector<8x128xf32>
    %cst_5 = arith.constant 0.000000e+00 : f32
    %8 = vector.broadcast %cst_5 : f32 to vector<8x128xf32>
    %9 = arith.maximumf %7, %8 : vector<8x128xf32>
    %10 = arith.truncf %9 : vector<8x128xf32> to vector<8x128xbf16>
    %c0_6 = arith.constant 0 : index
    %c0_7 = arith.constant 0 : index
    %11 = vector.load %arg4[%c0_6, %c0_7] : memref<128x128xbf16, #tpu.memory_space<vmem>>, vector<128x128xbf16>
    %cst_8 = arith.constant dense<0.000000e+00> : vector<8x128xf32>
    %12 = tpu.matmul %10, %11, %cst_8 {dimension_numbers = #tpu.dot_dimension_numbers<[1], [0], [0], [1], [0, 0, 1, 1], [], []>} : vector<8x128xbf16>, vector<128x128xbf16>, vector<8x128xf32> -> vector<8x128xf32>
    %c0_9 = arith.constant 0 : index
    %c0_10 = arith.constant 0 : index
    %13 = vector.load %arg5[%c0_9, %c0_10] : memref<1x128xf32, #tpu.memory_space<vmem>>, vector<1x128xf32>
    %14 = vector.broadcast %13 : vector<1x128xf32> to vector<8x128xf32>
    %15 = arith.addf %12, %14 : vector<8x128xf32>
    %16 = vector.extract_strided_slice %15 {offsets = [0, 0], sizes = [8, 10], strides = [1, 1]} : vector<8x128xf32> to vector<8x10xf32>
    %c0_11 = arith.constant 0 : index
    %c0_12 = arith.constant 0 : index
    %17 = vector.load %arg6[%c0_11, %c0_12] : memref<8x10xf32, #tpu.memory_space<vmem>>, vector<8x10xf32>
    tpu.vector_store %arg6[%c0_11, %c0_12], %16 {strides = array<i32>} : memref<8x10xf32, #tpu.memory_space<vmem>>, vector<8x10xf32>,
    return
  }
  func.func @transform_0(%arg0: i32) -> (i32, i32) {
    %c0_i32 = arith.constant 0 : i32
    %c0_i32_0 = arith.constant 0 : i32
    return %arg0, %c0_i32 : i32, i32
  }
  func.func @transform_1(%arg0: i32) -> (i32, i32) {
    %c0_i32 = arith.constant 0 : i32
    %c0_i32_0 = arith.constant 0 : i32
    %c0_i32_1 = arith.constant 0 : i32
    return %c0_i32, %c0_i32_0 : i32, i32
  }
  func.func @transform_2(%arg0: i32) -> (i32, i32) {
    %c0_i32 = arith.constant 0 : i32
    %c0_i32_0 = arith.constant 0 : i32
    %c0_i32_1 = arith.constant 0 : i32
    return %c0_i32, %c0_i32_0 : i32, i32
  }
  func.func @transform_3(%arg0: i32) -> (i32, i32) {
    %c0_i32 = arith.constant 0 : i32
    %c0_i32_0 = arith.constant 0 : i32
    %c0_i32_1 = arith.constant 0 : i32
    return %c0_i32, %c0_i32_0 : i32, i32
  }
  func.func @transform_4(%arg0: i32) -> (i32, i32) {
    %c0_i32 = arith.constant 0 : i32
    %c0_i32_0 = arith.constant 0 : i32
    %c0_i32_1 = arith.constant 0 : i32
    return %c0_i32, %c0_i32_0 : i32, i32
  }
  func.func @transform_5(%arg0: i32) -> (i32, i32) {
    %c0_i32 = arith.constant 0 : i32
    %c0_i32_0 = arith.constant 0 : i32
    return %arg0, %c0_i32 : i32, i32
  }
}

</mosaic_0001>

<bundles_post_ra>
// kernel: ai_model_forward.1
= control target key start
LH: loop header
LB: loop body
LE: loop exit
PB: predicated region body
PF: predicated region fallthrough
CT: control target
= control target key end

     0   :  { %10 = vsyncpa [#allocation3], 0  ;;  %s776_s0 = inlined_call_operand.vmem [shape: f32[8,784], index: 0, kind: input, shape index: {}]   ;;  %s777_s1 = inlined_call_operand.hbm [shape: f32[784,128], index: 1, kind: input, shape index: {}]   ;;  %s778_s2 = inlined_call_operand.vmem [shape: f32[1,128], index: 2, kind: input, shape index: {}]   ;;  %s779_s3 = inlined_call_operand.vmem [shape: bf16[128,128], index: 3, kind: input, shape index: {}]   ;;  %s780_s4 = inlined_call_operand.vmem [shape: f32[1,128], index: 4, kind: input, shape index: {}]   ;;  %s781_s5 = inlined_call_operand.hbm [shape: f32[8,10], index: 5, kind: output, shape index: {}]  }
   0x1   :  { %11 = vsyncpa [#allocation4], 0  ;;  %s670_s18 = smov [#allocation2]  }
   0x2   :  { %s19_s19 = sshll.u32 %s670_s18, 4  ;;  %s20_s19 = int_to_ptr.vmem [resolvable:$true] %s19_s19 }
   0x3   :  { %s634_s20 = scalar_lea.vmem %s20_s19, 12544  ;;  %p639_p1 = scmp.lt.s32.totalorder %s20_s19, %s20_s19 }
   0x4   :  { %p635_p0 = scmp.ne.s32.totalorder %s20_s19, %s634_s20  ;;  %p640_p2 = scmp.lt.s32.totalorder %s634_s20, %s634_s20 }
   0x6   :  { %p641_p3 = por %p640_p2, %p639_p1 }
   0x8   :  { %p642_p4 = pnand %p641_p3, %p635_p0 }
   0xa   :  { %645 = shalt.err (!%p642_p4)
}
   0xb   :  { %s671_s21 = smov 128   ;;  %s672_s22 = smov 8  }
   0xc   :  { %25 = dma.hbm_to_vmem [thread:$0]  %s777_s1, 12544, %s20_s19, [#allocation3], %s671_s21, %s671_s21, %s672_s22  }
   0xd   :  { %666 = dma.done.wait [#allocation3], 12544  }
   0xe   :  { %667 = vsyncadd [#allocation3], 4294954752  ;;  %v80_v0 = vld [vmem:[#allocation2 + $0xf0] sm:$0xff]  ;;  %v81_v1 = vld [vmem:[#allocation2 + $0xf8] sm:$0xff]  ;;  %vm674_vm0 = vmmov 0   ;;  %vm204_vm1 = vcmask 130048  }
   0xf   :  { %v64_v2 = vld [vmem:[#allocation2 + $0x70] sm:$0xff]  ;;  %v163_v3 = vpack.c.bf16 %v81_v1, %v80_v0  ;;  %v65_v4 = vld [vmem:[#allocation2 + $0x78] sm:$0xff]  ;;  %v78_v11 = vld [vmem:[#allocation2 + $0xe0] sm:$0xff]  ;;  %s675_s30 = smov [#allocation5]   ;;  %vm481_vm2 = vcmask 80896  }
  0x10   :  { %v112_v5 = vld [vmem:[#allocation2 + $0x1f0] sm:$0xff]  ;;  %v113_v6 = vld [vmem:[#allocation2 + $0x1f8] sm:$0xff]  ;;  %v155_v7 = vpack.c.bf16 %v65_v4, %v64_v2  ;;  %v79_v13 = vld [vmem:[#allocation2 + $0xe8] sm:$0xff]  ;;  %s489_s6 = sshll.u32 %s675_s30, 4  ;;  %s490_s6 = int_to_ptr.vmem [resolvable:$true] %s489_s6 }
  0x11   :  { %v179_v8 = vpack.c.bf16 %v113_v6, %v112_v5  ;;  %v96_v9 = vld [vmem:[#allocation2 + $0x170] sm:$0xff]  ;;  %v97_v10 = vld [vmem:[#allocation2 + $0x178] sm:$0xff]  ;;  %509 = vmatprep.subr.bf16.mxu0 %v163_v3  ;;  %v62_v14 = vld [vmem:[#allocation2 + $0x60] sm:$0xff]  ;;  %v162_v16 = vpack.c.bf16 %v79_v13, %v78_v11  ;;  %p651_p6 = scmp.lt.s32.totalorder %s490_s6, %s490_s6 }
  0x12   :  { %v171_v12 = vpack.c.bf16 %v97_v10, %v96_v9  ;;  %v63_v15 = vld [vmem:[#allocation2 + $0x68] sm:$0xff]  ;;  %510 = vmatpush3.bf16.msra.mxu0 %v155_v7  ;;  %v110_v18 = vld [vmem:[#allocation2 + $0x1e0] sm:$0xff]  ;;  %v76_v23 = vld [vmem:[#allocation2 + $0xd0] sm:$0xff] }
  0x13   :  { %531 = vmatprep.subr.bf16.mxu1 %v179_v8  ;;  %v154_v17 = vpack.c.bf16 %v63_v15, %v62_v14  ;;  %v111_v19 = vld [vmem:[#allocation2 + $0x1e8] sm:$0xff]  ;;  %v94_v20 = vld [vmem:[#allocation2 + $0x160] sm:$0xff]  ;;  %v77_v24 = vld [vmem:[#allocation2 + $0xd8] sm:$0xff]  ;;  %511 = vmatprep.subr.bf16.mxu0 %v162_v16 }
  0x14   :  { %532 = vmatpush3.bf16.msra.mxu1 %v171_v12  ;;  %v178_v21 = vpack.c.bf16 %v111_v19, %v110_v18  ;;  %v95_v22 = vld [vmem:[#allocation2 + $0x168] sm:$0xff]  ;;  %v161_v26 = vpack.c.bf16 %v77_v24, %v76_v23  ;;  %v60_v27 = vld [vmem:[#allocation2 + $0x50] sm:$0xff]  ;;  %v61_v28 = vld [vmem:[#allocation2 + $0x58] sm:$0xff] }
  0x15   :  { %v170_v25 = vpack.c.bf16 %v95_v22, %v94_v20  ;;  %v108_v29 = vld [vmem:[#allocation2 + $0x1d0] sm:$0xff]  ;;  %v109_v30 = vld [vmem:[#allocation2 + $0x1d8] sm:$0xff]  ;;  %v153_v33 = vpack.c.bf16 %v61_v28, %v60_v27  ;;  %v74_v35 = vld [vmem:[#allocation2 + $0xc0] sm:$0xff] }
  0x16   :  { %533 = vmatprep.subr.bf16.mxu1 %v178_v21  ;;  %v92_v31 = vld [vmem:[#allocation2 + $0x150] sm:$0xff]  ;;  %v93_v32 = vld [vmem:[#allocation2 + $0x158] sm:$0xff]  ;;  %512 = vmatpush3.bf16.msra.mxu0 %v154_v17  ;;  %v177_v34 = vpack.c.bf16 %v109_v30, %v108_v29  ;;  %v75_v36 = vld [vmem:[#allocation2 + $0xc8] sm:$0xff] }
  0x17   :  { %v58_v37 = vld [vmem:[#allocation2 + $0x40] sm:$0xff]  ;;  %513 = vmatprep.subr.bf16.mxu0 %v161_v26  ;;  %v169_v38 = vpack.c.bf16 %v93_v32, %v92_v31  ;;  %v160_v39 = vpack.c.bf16 %v75_v36, %v74_v35  ;;  %v59_v40 = vld [vmem:[#allocation2 + $0x48] sm:$0xff]  ;;  %v72_v46 = vld [vmem:[#allocation2 + $0xb0] sm:$0xff] }
  0x18   :  { %534 = vmatpush3.bf16.msra.mxu1 %v170_v25  ;;  %v106_v41 = vld [vmem:[#allocation2 + $0x1c0] sm:$0xff]  ;;  %v107_v42 = vld [vmem:[#allocation2 + $0x1c8] sm:$0xff]  ;;  %v73_v47 = vld [vmem:[#allocation2 + $0xb8] sm:$0xff]  ;;  %v152_v48 = vpack.c.bf16 %v59_v40, %v58_v37 }
  0x19   :  { %535 = vmatprep.subr.bf16.mxu1 %v177_v34  ;;  %v176_v43 = vpack.c.bf16 %v107_v42, %v106_v41  ;;  %v90_v44 = vld [vmem:[#allocation2 + $0x140] sm:$0xff]  ;;  %v91_v45 = vld [vmem:[#allocation2 + $0x148] sm:$0xff]  ;;  %v104_v49 = vld [vmem:[#allocation2 + $0x1b0] sm:$0xff]  ;;  %v159_v52 = vpack.c.bf16 %v73_v47, %v72_v46 }
  0x1a   :  { %514 = vmatpush3.bf16.msra.mxu0 %v153_v33  ;;  %v105_v50 = vld [vmem:[#allocation2 + $0x1b8] sm:$0xff]  ;;  %v168_v51 = vpack.c.bf16 %v91_v45, %v90_v44  ;;  %v56_v53 = vld [vmem:[#allocation2 + $0x30] sm:$0xff]  ;;  %v70_v58 = vld [vmem:[#allocation2 + $0xa0] sm:$0xff] }
  0x1b   :  { %515 = vmatprep.subr.bf16.mxu0 %v160_v39  ;;  %v57_v54 = vld [vmem:[#allocation2 + $0x38] sm:$0xff]  ;;  %v88_v55 = vld [vmem:[#allocation2 + $0x130] sm:$0xff]  ;;  %v175_v56 = vpack.c.bf16 %v105_v50, %v104_v49  ;;  %v71_v59 = vld [vmem:[#allocation2 + $0xa8] sm:$0xff] }
  0x1c   :  { %536 = vmatpush3.bf16.msra.mxu1 %v169_v38  ;;  %v89_v57 = vld [vmem:[#allocation2 + $0x138] sm:$0xff]  ;;  %v102_v60 = vld [vmem:[#allocation2 + $0x1a0] sm:$0xff]  ;;  %v103_v61 = vld [vmem:[#allocation2 + $0x1a8] sm:$0xff]  ;;  %v151_v62 = vpack.c.bf16 %v57_v54, %v56_v53  ;;  %v158_v0 = vpack.c.bf16 %v71_v59, %v70_v58 }
  0x1d   :  { %537 = vmatprep.subr.bf16.mxu1 %v176_v43  ;;  %v167_v63 = vpack.c.bf16 %v89_v57, %v88_v55  ;;  %v54_v1 = vld [vmem:[#allocation2 + $0x20] sm:$0xff]  ;;  %v55_v2 = vld [vmem:[#allocation2 + $0x28] sm:$0xff]  ;;  %v174_v4 = vpack.c.bf16 %v103_v61, %v102_v60  ;;  %v68_v6 = vld [vmem:[#allocation2 + $0x90] sm:$0xff]  ;;  %v673_v55 = vmov 0.0  }
  0x1e   :  { %516 = vmatpush3.bf16.msra.mxu0 %v152_v48  ;;  %v86_v3 = vld [vmem:[#allocation2 + $0x120] sm:$0xff]  ;;  %v87_v5 = vld [vmem:[#allocation2 + $0x128] sm:$0xff]  ;;  %v69_v7 = vld [vmem:[#allocation2 + $0x98] sm:$0xff]  ;;  %v150_v10 = vpack.c.bf16 %v55_v2, %v54_v1 }
  0x1f   :  { %517 = vmatprep.subr.bf16.mxu0 %v159_v52  ;;  %v100_v8 = vld [vmem:[#allocation2 + $0x190] sm:$0xff]  ;;  %v101_v9 = vld [vmem:[#allocation2 + $0x198] sm:$0xff]  ;;  %v37_v12 = vld [vmem:[%s776_s0 + $0x8] sm:$0xff]  ;;  %v166_v13 = vpack.c.bf16 %v87_v5, %v86_v3  ;;  %v157_v14 = vpack.c.bf16 %v69_v7, %v68_v6 }
  0x20   :  { %538 = vmatpush3.bf16.msra.mxu1 %v168_v51  ;;  %v52_v11 = vld [vmem:[#allocation2 + $0x10] sm:$0xff]  ;;  %v53_v15 = vld [vmem:[#allocation2 + $0x18] sm:$0xff]  ;;  %v44_v18 = vpack.c.bf16 %v37_v12, %v37_v12  ;;  %v173_v19 = vpack.c.bf16 %v101_v9, %v100_v8  ;;  %v66_v20 = vld [vmem:[#allocation2 + $0x80] sm:$0xff] }
  0x21   :  { %539 = vmatprep.subr.bf16.mxu1 %v175_v56  ;;  %v84_v16 = vld [vmem:[#allocation2 + $0x110] sm:$0xff]  ;;  %v85_v17 = vld [vmem:[#allocation2 + $0x118] sm:$0xff]  ;;  %v67_v21 = vld [vmem:[#allocation2 + $0x88] sm:$0xff]  ;;  %v149_v26 = vpack.c.bf16 %v53_v15, %v52_v11 }
  0x22   :  { %518 = vmatpush3.bf16.msra.mxu0 %v151_v62  ;;  %v39_v22 = vld [vmem:[%s776_s0 + $0x18] sm:$0xff]  ;;  %v98_v23 = vld [vmem:[#allocation2 + $0x180] sm:$0xff]  ;;  %v99_v24 = vld [vmem:[#allocation2 + $0x188] sm:$0xff]  ;;  %240 = vmatprep.mubr.bf16.mxu0 %v44_v18  ;;  %v165_v27 = vpack.c.bf16 %v85_v17, %v84_v16  ;;  %v156_v28 = vpack.c.bf16 %v67_v21, %v66_v20 }
  0x23   :  { %519 = vmatprep.subr.bf16.mxu0 %v158_v0  ;;  %v46_v25 = vpack.c.bf16 %v39_v22, %v39_v22  ;;  %v50_v29 = vld [vmem:[#allocation2] sm:$0xff]  ;;  %v51_v30 = vld [vmem:[#allocation2 + $0x8] sm:$0xff]  ;;  %v172_v32 = vpack.c.bf16 %v99_v24, %v98_v23  ;;  %v144_v34 = vld [vmem:[#allocation2 + $0x2f0] sm:$0xff] }
  0x24   :  { %540 = vmatpush3.bf16.msra.mxu1 %v167_v63  ;;  %v82_v31 = vld [vmem:[#allocation2 + $0x100] sm:$0xff]  ;;  %v83_v33 = vld [vmem:[#allocation2 + $0x108] sm:$0xff]  ;;  %v145_v35 = vld [vmem:[#allocation2 + $0x2f8] sm:$0xff]  ;;  %v148_v36 = vpack.c.bf16 %v51_v30, %v50_v29 }
  0x25   :  { %541 = vmatprep.subr.bf16.mxu1 %v174_v4  ;;  %280 = vmatprep.mubr.bf16.mxu1 %v46_v25  ;;  %v36_v37 = vld [vmem:[%s776_s0] sm:$0xff]  ;;  %v164_v38 = vpack.c.bf16 %v83_v33, %v82_v31  ;;  %v195_v39 = vpack.c.bf16 %v145_v35, %v144_v34  ;;  %v128_v40 = vld [vmem:[#allocation2 + $0x270] sm:$0xff]  ;;  %v129_v41 = vld [vmem:[#allocation2 + $0x278] sm:$0xff] }
  0x26   :  { %520 = vmatpush3.bf16.msra.mxu0 %v150_v10  ;;  %v38_v42 = vld [vmem:[%s776_s0 + $0x10] sm:$0xff]  ;;  %v142_v43 = vld [vmem:[#allocation2 + $0x2e0] sm:$0xff]  ;;  %v143_v44 = vld [vmem:[#allocation2 + $0x2e8] sm:$0xff]  ;;  %v43_v45 = vpack.c.bf16 %v36_v37, %v36_v37  ;;  %v187_v46 = vpack.c.bf16 %v129_v41, %v128_v40 }
  0x27   :  { %521 = vmatprep.subr.bf16.mxu0 %v157_v14  ;;  %v45_v47 = vpack.c.bf16 %v38_v42, %v38_v42  ;;  %v126_v48 = vld [vmem:[#allocation2 + $0x260] sm:$0xff]  ;;  %v194_v49 = vpack.c.bf16 %v143_v44, %v142_v43  ;;  %v127_v50 = vld [vmem:[#allocation2 + $0x268] sm:$0xff]  ;;  %v140_v53 = vld [vmem:[#allocation2 + $0x2d0] sm:$0xff] }
  0x28   :  { %542 = vmatpush3.bf16.msra.mxu1 %v166_v13  ;;  %v146_v51 = vld [vmem:[#allocation2 + $0x300] sm:$0xff]  ;;  %v147_v52 = vld [vmem:[#allocation2 + $0x308] sm:$0xff]  ;;  %v141_v54 = vld [vmem:[#allocation2 + $0x2d8] sm:$0xff]  ;;  %v186_v62 = vpack.c.bf16 %v127_v50, %v126_v48 }
  0x29   :  { %543 = vmatprep.subr.bf16.mxu1 %v173_v19  ;;  %v196_v56 = vpack.c.bf16 %v147_v52, %v146_v51  ;;  %v41_v57 = vld [vmem:[%s776_s0 + $0x28] sm:$0xff]  ;;  %v124_v58 = vld [vmem:[#allocation2 + $0x250] sm:$0xff]  ;;  %v125_v59 = vld [vmem:[#allocation2 + $0x258] sm:$0xff]  ;;  %v193_v1 = vpack.c.bf16 %v141_v54, %v140_v53 }
  0x2a   :  { %522 = vmatpush3.bf16.msra.mxu0 %v149_v26  ;;  %v48_v60 = vpack.c.bf16 %v41_v57, %v41_v57  ;;  %v42_v61 = vld [vmem:[%s776_s0 + $0x30] sm:$0xff]  ;;  %v138_v63 = vld [vmem:[#allocation2 + $0x2c0] sm:$0xff]  ;;  %v139_v0 = vld [vmem:[#allocation2 + $0x2c8] sm:$0xff]  ;;  %v185_v2 = vpack.c.bf16 %v125_v59, %v124_v58 }
  0x2b   :  { %523 = vmatprep.subr.bf16.mxu0 %v156_v28  ;;  %v49_v3 = vpack.c.bf16 %v42_v61, %v42_v61  ;;  %v192_v4 = vpack.c.bf16 %v139_v0, %v138_v63  ;;  %v122_v5 = vld [vmem:[#allocation2 + $0x240] sm:$0xff]  ;;  %v123_v6 = vld [vmem:[#allocation2 + $0x248] sm:$0xff]  ;;  %v136_v7 = vld [vmem:[#allocation2 + $0x2b0] sm:$0xff] }
  0x2c   :  { %544 = vmatpush3.bf16.msra.mxu1 %v165_v27  ;;  %v137_v8 = vld [vmem:[#allocation2 + $0x2b8] sm:$0xff]  ;;  %v184_v9 = vpack.c.bf16 %v123_v6, %v122_v5  ;;  %v120_v11 = vld [vmem:[#allocation2 + $0x230] sm:$0xff]  ;;  %v134_v13 = vld [vmem:[#allocation2 + $0x2a0] sm:$0xff] }
  0x2d   :  { %545 = vmatprep.subr.bf16.mxu1 %v172_v32  ;;  %v191_v10 = vpack.c.bf16 %v137_v8, %v136_v7  ;;  %v121_v12 = vld [vmem:[#allocation2 + $0x238] sm:$0xff]  ;;  %v135_v14 = vld [vmem:[#allocation2 + $0x2a8] sm:$0xff]  ;;  %v118_v17 = vld [vmem:[#allocation2 + $0x220] sm:$0xff] }
  0x2e   :  { %524 = vmatpush3.bf16.msra.mxu0 %v148_v36  ;;  %v183_v15 = vpack.c.bf16 %v121_v12, %v120_v11  ;;  %v190_v16 = vpack.c.bf16 %v135_v14, %v134_v13  ;;  %v119_v18 = vld [vmem:[#allocation2 + $0x228] sm:$0xff]  ;;  %v132_v19 = vld [vmem:[#allocation2 + $0x290] sm:$0xff]  ;;  %v133_v20 = vld [vmem:[#allocation2 + $0x298] sm:$0xff] }
  0x2f   :  { %553 = vmatprep.subr.bf16.mxu0 %v195_v39  ;;  %v182_v21 = vpack.c.bf16 %v119_v18, %v118_v17  ;;  %v189_v22 = vpack.c.bf16 %v133_v20, %v132_v19  ;;  %v116_v23 = vld [vmem:[#allocation2 + $0x210] sm:$0xff]  ;;  %v117_v24 = vld [vmem:[#allocation2 + $0x218] sm:$0xff]  ;;  %v130_v25 = vld [vmem:[#allocation2 + $0x280] sm:$0xff] }
  0x30   :  { %546 = vmatpush3.bf16.msra.mxu1 %v164_v38  ;;  %v131_v26 = vld [vmem:[#allocation2 + $0x288] sm:$0xff]  ;;  %v181_v27 = vpack.c.bf16 %v117_v24, %v116_v23  ;;  %v114_v29 = vld [vmem:[#allocation2 + $0x200] sm:$0xff]  ;;  %v618_v34 = vld [vmem:[%s779_s3 + $0x38] sm:$0xff]  }
  0x31   :  { %586 = vmatprep.subr.bf16.mxu1 %v673_v55  ;;  %241 = vmatmul.mubr.bf16.vlgmr.msra.gmra.mxu0 %v43_v45  ;;  %v188_v28 = vpack.c.bf16 %v131_v26, %v130_v25  ;;  %v115_v30 = vld [vmem:[#allocation2 + $0x208] sm:$0xff]  ;;  %v40_v32 = vld [vmem:[%s776_s0 + $0x20] sm:$0xff]  ;;  %v619_v35 = vld [vmem:[%s779_s3 + $0x30] sm:$0xff]  }
  0x32   :  { %554 = vmatpush3.bf16.msra.mxu0 %v187_v46  ;;  %320 = vmatprep.mubr.bf16.mxu0 %v48_v60  ;;  %v180_v31 = vpack.c.bf16 %v115_v30, %v114_v29  ;;  %v47_v33 = vpack.c.bf16 %v40_v32, %v40_v32  ;;  %v620_v36 = vld [vmem:[%s779_s3 + $0x28] sm:$0xff]   ;;  %v621_v37 = vld [vmem:[%s779_s3 + $0x20] sm:$0xff]   ;;  %v622_v38 = vld [vmem:[%s779_s3 + $0x18] sm:$0xff]  }
  0x33   :  { %281 = vmatmul.mubr.bf16.vlgmr.msra.gmra.mxu1 %v45_v47  ;;  %555 = vmatprep.subr.bf16.mxu0 %v194_v49  ;;  %v623_v39 = vld [vmem:[%s779_s3 + $0x10] sm:$0xff]   ;;  %v624_v40 = vld [vmem:[%s779_s3 + $0x8] sm:$0xff]   ;;  %v625_v41 = vld [vmem:[%s779_s3] sm:$0xff]  }
  0x34   :  { %587 = vmatpush3.bf16.msra.mxu1 %v196_v56  ;;  %588 = vmatprep.mubr.msk.bf16.mxu1 %vm674_vm0, %v673_v55 }
  0x35   :  { %592 = vmatprep.subr.bf16.mxu1 %v673_v55 }
  0x36   :  { %556 = vmatpush3.bf16.msra.mxu0 %v186_v62 }
  0x37   :  { %557 = vmatprep.subr.bf16.mxu0 %v193_v1 }
  0x3a   :  { %558 = vmatpush3.bf16.msra.mxu0 %v185_v2 }
  0x3b   :  { %589 = vmatmul.mubr.msk.bf16.vlgmr.msra.gmra.mxu1 %vm204_vm1, %v49_v3  ;;  %559 = vmatprep.subr.bf16.mxu0 %v192_v4  ;;  %v500_v4 = vld [vmem:[%s780_s4] ss:$0 sm:$0xff] }
  0x3c   :  { %608 = vmatprep.mubr.msk.bf16.mxu1 %vm674_vm0, %v673_v55  ;;  %593 = vmatpush3.bf16.msra.mxu1 %v618_v34 }
  0x3d   :  { %594 = vmatprep.subr.bf16.mxu1 %v673_v55 }
  0x3e   :  { %560 = vmatpush3.bf16.msra.mxu0 %v184_v9 }
  0x3f   :  { %561 = vmatprep.subr.bf16.mxu0 %v191_v10 }
  0x40   :  { %595 = vmatpush3.bf16.msra.mxu1 %v619_v35 }
  0x41   :  { %596 = vmatprep.subr.bf16.mxu1 %v673_v55 }
  0x42   :  { %562 = vmatpush3.bf16.msra.mxu0 %v183_v15 }
  0x43   :  { %563 = vmatprep.subr.bf16.mxu0 %v190_v16 }
  0x44   :  { %597 = vmatpush3.bf16.msra.mxu1 %v620_v36 }
  0x45   :  { %598 = vmatprep.subr.bf16.mxu1 %v673_v55 }
  0x46   :  { %564 = vmatpush3.bf16.msra.mxu0 %v182_v21 }
  0x47   :  { %565 = vmatprep.subr.bf16.mxu0 %v189_v22 }
  0x48   :  { %599 = vmatpush3.bf16.msra.mxu1 %v621_v37 }
  0x49   :  { %600 = vmatprep.subr.bf16.mxu1 %v673_v55 }
  0x4a   :  { %566 = vmatpush3.bf16.msra.mxu0 %v181_v27 }
  0x4b   :  { %567 = vmatprep.subr.bf16.mxu0 %v188_v28 }
  0x4c   :  { %601 = vmatpush3.bf16.msra.mxu1 %v622_v38 }
  0x4d   :  { %602 = vmatprep.subr.bf16.mxu1 %v673_v55 }
  0x4e   :  { %568 = vmatpush3.bf16.msra.mxu0 %v180_v31 }
  0x50   :  { %603 = vmatpush3.bf16.msra.mxu1 %v623_v39 }
  0x51   :  { %321 = vmatmul.mubr.bf16.vlgmr.msra.gmra.mxu0 %v47_v33  ;;  %604 = vmatprep.subr.bf16.mxu1 %v673_v55 }
  0x54   :  { %605 = vmatpush3.bf16.msra.mxu1 %v624_v40 }
  0x55   :  { %606 = vmatprep.subr.bf16.mxu1 %v673_v55  ;;  %v498_v55 = vld [vmem:[%s778_s2] ss:$0 sm:$0xff]  ;;  %s646_s2 = scalar_lea.vmem %s490_s6, 128 }
  0x56   :  { %p647_p5 = scmp.ne.s32.totalorder %s490_s6, %s646_s2  ;;  %p652_p7 = scmp.lt.s32.totalorder %s646_s2, %s646_s2 }
  0x58   :  { %607 = vmatpush3.bf16.msra.mxu1 %v625_v41  ;;  %p653_p8 = por %p652_p7, %p651_p6 }
  0x5a   :  { %p654_p9 = pnand %p653_p8, %p647_p5 }
  0xf1   :  { %v525_v42 = vpop.f32.mrf.mxu0 }
  0xf3   :  { %v547_v43 = vpop.f32.mrf.mxu1  ;;  %v526_v44 = vpop.f32.mrf.mxu0 }
  0xf4   :  { %v527_v54 = vadd.f32 %v526_v44, %v525_v42 }
  0xf5   :  { %v548_v45 = vpop.f32.mrf.mxu1  ;;  %v528_v46 = vpop.f32.mrf.mxu0 }
  0xf6   :  { %v243_v56 = vadd.f32 %v527_v54, %v498_v55  ;;  %v549_v57 = vadd.f32 %v548_v45, %v547_v43 }
  0xf7   :  { %v550_v47 = vpop.f32.mrf.mxu1  ;;  %v529_v48 = vpop.f32.mrf.mxu0 }
  0xf8   :  { %v283_v60 = vadd.f32 %v549_v57, %v243_v56 }
  0xf9   :  { %v551_v49 = vpop.f32.mrf.mxu1 }
  0xfb   :  { %v362_v50 = vpop.f32.mrf.mxu1 }
  0xfd   :  { %v590_v51 = vpop.f32.mrf.mxu1 }
  0xff   :  { %v365_v52 = vpop.f32.mrf.mxu1 }
 0x101   :  { %v591_v53 = vpop.f32.mrf.mxu1 }
 0x111   :  { %v569_v58 = vpop.f32.mrf.mxu0 }
 0x113   :  { %v570_v59 = vpop.f32.mrf.mxu0 }
 0x114   :  { %v571_v61 = vadd.f32 %v570_v59, %v569_v58 }
 0x115   :  { %v572_v62 = vpop.f32.mrf.mxu0 }
 0x116   :  { %v323_v63 = vadd.f32 %v571_v61, %v283_v60 }
 0x117   :  { %v573_v0 = vpop.f32.mrf.mxu0 }
 0x118   :  { %v363_v1 = vadd.f32 %v362_v50, %v323_v63 }
 0x11a   :  { %v368_v2 = vmax.f32 %v363_v1, 0.0 }
 0x11c   :  { %v369_v3 = vpack.c.bf16 %v368_v2, %v368_v2 }
 0x11e   :  { %609 = vmatmul.mubr.bf16.vlgmr.msra.gmra.mxu1 %v369_v3 }
 0x1de   :  { %v475_v5 = vpop.f32.mrf.mxu1 }
 0x1df   :  { %v476_v6 = vadd.f32 %v500_v4, %v475_v5 }
 0x1e0   :  { %v610_v7 = vpop.f32.mrf.mxu1 }
 0x1e1   :  { %482 = vst.msk [vmem:[#allocation5] sm:$0xff] %vm481_vm2, %v476_v6 }
 0x1e2   :  { %v478_v8 = vpop.f32.mrf.mxu1 }
 0x1e3   :  { %657 = shalt.err (!%p654_p9)
}
 0x1e4   :  { %492 = dma.vmem_to_hbm [thread:$0]  %s490_s6, 128, %s781_s5, [#allocation4]   ;;  %v611_v9 = vpop.f32.mrf.mxu1 }
 0x1e5   :  { %668 = dma.done.wait [#allocation4], 128  }
 0x1e6   :  { %669 = vsyncadd [#allocation4], 4294967168 }
 0x1e7   :  { %496 = vsyncpa [#allocation3], 1 }
 0x1e8   :  { %497 = vsyncpa [#allocation4], 1 }

</bundles_post_ra>
